<compile_context>
chip_gen: v6e
topology: v6e:2x2x1
jax: 0.10.0
libtpu: 0.0.40
codegen_flags: <defaults>
</compile_context>

<pallas_src>
import functools

import numpy as np
import jax
import jax.numpy as jnp
from jax.experimental import pallas as pl
from jax.experimental.pallas import tpu as pltpu


_UNROLL_MAX = 8  # fully unroll short recurrences; fori_loop(unroll=2) beyond this


def _round_up(x, m):
    return (x + m - 1) // m * m


# -----------------------------------------------------------------------------
# Hardware queries.  Fallbacks are conservative and only influence block sizing
# / VMEM limits, never numerics.
# -----------------------------------------------------------------------------
def _vmem_capacity_bytes():
    try:
        return int(pltpu.get_tpu_info().vmem_capacity_bytes)
    except Exception:
        return 64 << 20  # v7x per-TC VMEM: safe lower bound for all generations


def _num_tensorcores_per_chip():
    try:
        kind = (jax.devices()[0].device_kind or "").lower()
    except Exception:
        return 1
    # v5e / v6e are single-TensorCore; v7x has two TCs per chip.
    return 2 if ("v7" in kind or "7x" in kind) else 1


def _choose_batch_block(batch, s_pad, per_b_bytes, vmem_cap, num_tc):
    """Largest batch block that fits the VMEM budget.  No forced grid split on
    single-TC chips; on 2-TC chips split only if each core keeps >=256 M rows."""
    budget = max(per_b_bytes, int(vmem_cap * 0.45))
    bt = max(1, min(batch, budget // per_b_bytes))
    while batch % bt:
        bt -= 1
    if num_tc >= 2 and bt == batch and batch >= 2:
        half = batch // 2
        while half > 0 and batch % half:
            half -= 1
        if 0 < half < batch and half * s_pad >= 256:
            bt = half
    return bt


def _vmem_limit(state_block_bytes, weight_bytes, vmem_cap):
    # in/out double-buffered states + weights + temp headroom, capped at 75% of
    # physical VMEM (leaves Mosaic scratch headroom, esp. on v7x's 64 MiB).
    need = 6 * state_block_bytes + 2 * weight_bytes + (8 << 20)
    return int(min(max(need, 32 << 20), (vmem_cap * 3) // 4))


# -----------------------------------------------------------------------------
# Host-side weight preparation.
# Node-type order everywhere below: (e, l, i, m).
#   gate weights  : vars_z_in index  e->3, l->0, i->1, m->2
#   candidate     : (out_h, out_x) pairs  e->(0,1), l->(2,3), i->(4,5), m->(6,7)
# -----------------------------------------------------------------------------
_ZIDX = (3, 0, 1, 2)


def _fold_gates(W_z, d):
    """(4, 2D, 2D) -> (4, D, 2D): cat([h,h],-1) @ Wz == h @ (Wz[:D] + Wz[D:])."""
    return W_z[:, :d, :] + W_z[:, d:, :]


def _build_packed_weights(W_z, W_hx, d, lanes):
    """Block-diagonal weights for the lane-packed path (4*D <= lanes=128).

    Gate:  (lanes, 2*lanes)   r lands in cols [0:lanes], z in [lanes:2*lanes].
    Cand:  (2*lanes, lanes)   rows [0:lanes] act on r*h, rows [lanes:] act on h.
    """
    wz_fold = _fold_gates(W_z, d)
    wz_pack = jnp.zeros((lanes, 2 * lanes), jnp.float32)
    whx_pack = jnp.zeros((2 * lanes, lanes), jnp.float32)
    for t in range(4):
        o = t * d
        wf = wz_fold[_ZIDX[t]]
        wz_pack = wz_pack.at[o:o + d, o:o + d].set(wf[:, :d])                     # r
        wz_pack = wz_pack.at[o:o + d, lanes + o:lanes + o + d].set(wf[:, d:])     # z
        whx_pack = whx_pack.at[o:o + d, o:o + d].set(W_hx[2 * t])                 # W_h on r*h
        whx_pack = whx_pack.at[lanes + o:lanes + o + d, o:o + d].set(W_hx[2 * t + 1])  # W_x on h
    return wz_pack.astype(jnp.bfloat16), whx_pack.astype(jnp.bfloat16)


def _build_stacked_weights(W_z, W_hx, d, dp):
    """Per-type stacks (fallback path, 4*D > 128), lane-padded to Dp, type order (e,l,i,m)."""
    wz_fold = _fold_gates(W_z, d)
    wz_p = jnp.zeros((4, dp, 2 * dp), jnp.float32)
    whx_p = jnp.zeros((4, 2 * dp, dp), jnp.float32)
    for t in range(4):
        wf = wz_fold[_ZIDX[t]]
        wz_p = wz_p.at[t, :d, :d].set(wf[:, :d])
        wz_p = wz_p.at[t, :d, dp:dp + d].set(wf[:, d:])
        whx_p = whx_p.at[t, :d, :d].set(W_hx[2 * t])
        whx_p = whx_p.at[t, dp:dp + d, :d].set(W_hx[2 * t + 1])
    return wz_p.astype(jnp.bfloat16), whx_p.astype(jnp.bfloat16)


# -----------------------------------------------------------------------------
# Kernels
# -----------------------------------------------------------------------------
def tggann_packed_kernel(hp_ref, wz_ref, whx_ref, hp_out, *, loop_num):
    """All four node types lane-packed into one tensor; block-diagonal weights
    keep the types independent.  One gate + one candidate matmul per step."""
    f32 = jnp.float32
    bf16 = jnp.bfloat16
    bt, sp, lp = hp_ref.shape
    m = bt * sp

    def step(h):
        h_bf = h.astype(bf16)                                   # hoisted, reused twice
        gate = jax.nn.sigmoid(
            jnp.dot(h_bf, wz_ref[...], preferred_element_type=f32))
        r = gate[:, :lp]
        z = gate[:, lp:]
        cand_in = jnp.concatenate([(r * h).astype(bf16), h_bf], axis=-1)
        h_cand = jnp.tanh(
            jnp.dot(cand_in, whx_ref[...], preferred_element_type=f32))
        # NOTE: second tanh matches the PyTorch module (tanh applied twice).
        return h + z * (jnp.tanh(h_cand) - h)

    h = hp_ref[...].reshape(m, lp).astype(f32)
    if loop_num <= _UNROLL_MAX:
        for _ in range(loop_num):
            h = step(h)
    else:
        h = jax.lax.fori_loop(0, loop_num, lambda _, c: step(c), h, unroll=2)
    hp_out[...] = h.reshape(bt, sp, lp).astype(hp_out.dtype)


def tggann_multi_kernel(he_ref, hl_ref, hi_ref, hm_ref, wz_ref, whx_ref,
                        he_o, hl_o, hi_o, hm_o, *, loop_num):
    """Fallback path (4*D > 128): one GRU-style cell per node type.  Weight refs
    are indexed per gate at the dot sites (no whole-stack value loads)."""
    f32 = jnp.float32
    bf16 = jnp.bfloat16
    bt, sp, dp = he_ref.shape
    m = bt * sp

    def cell(h, t):
        h_bf = h.astype(bf16)
        gate = jax.nn.sigmoid(
            jnp.dot(h_bf, wz_ref[t], preferred_element_type=f32))
        r = gate[:, :dp]
        z = gate[:, dp:]
        cand_in = jnp.concatenate([(r * h).astype(bf16), h_bf], axis=-1)
        h_cand = jnp.tanh(jnp.dot(cand_in, whx_ref[t], preferred_element_type=f32))
        return h + z * (jnp.tanh(h_cand) - h)   # double tanh matches the module

    def step(carry):
        return tuple(cell(h, t) for t, h in enumerate(carry))

    carry = (he_ref[...].reshape(m, dp).astype(f32),
             hl_ref[...].reshape(m, dp).astype(f32),
             hi_ref[...].reshape(m, dp).astype(f32),
             hm_ref[...].reshape(m, dp).astype(f32))
    if loop_num <= _UNROLL_MAX:
        for _ in range(loop_num):
            carry = step(carry)
    else:
        carry = jax.lax.fori_loop(0, loop_num, lambda _, c: step(c), carry, unroll=2)

    h_e, h_l, h_i, h_m = carry
    he_o[...] = h_e.reshape(bt, sp, dp).astype(he_o.dtype)
    hl_o[...] = h_l.reshape(bt, sp, dp).astype(hl_o.dtype)
    hi_o[...] = h_i.reshape(bt, sp, dp).astype(hi_o.dtype)
    hm_o[...] = h_m.reshape(bt, sp, dp).astype(hm_o.dtype)


# -----------------------------------------------------------------------------
# Wrappers
# -----------------------------------------------------------------------------
def _forward_packed(h_e0, h_m0, h_l0, h_i0, W_z, W_hx, loop_num, batch_block,
                    vmem_cap, num_tc, io_dtype):
    B, S, D = h_e0.shape
    Sp = _round_up(S, 8)
    L = 4 * D
    Lp = 128  # 4*D <= 128 on this path

    wz_p, whx_p = _build_packed_weights(W_z, W_hx, D, Lp)

    # Pack the four states along lanes in type order (e, l, i, m).
    hp = jnp.concatenate([h_e0, h_l0, h_i0, h_m0], axis=-1)            # (B, S, 4D)
    hp = jnp.pad(hp, ((0, 0), (0, Sp - S), (0, Lp - L))).astype(io_dtype)

    per_b = 40 * Sp * Lp
    Bt = batch_block if batch_block is not None else _choose_batch_block(
        B, Sp, per_b, vmem_cap, num_tc)
    assert B % Bt == 0, "batch must be divisible by the batch block"

    state_block_bytes = Bt * Sp * Lp * jnp.dtype(io_dtype).itemsize
    weight_bytes = (wz_p.size + whx_p.size) * 2
    vmem_limit = _vmem_limit(state_block_bytes, weight_bytes, vmem_cap)

    state_spec = pl.BlockSpec((Bt, Sp, Lp), lambda b: (b, 0, 0))
    wz_spec = pl.BlockSpec((Lp, 2 * Lp), lambda b: (0, 0))
    whx_spec = pl.BlockSpec((2 * Lp, Lp), lambda b: (0, 0))

    out = pl.pallas_call(
        functools.partial(tggann_packed_kernel, loop_num=loop_num),
        out_shape=jax.ShapeDtypeStruct((B, Sp, Lp), io_dtype),
        grid_spec=pltpu.PrefetchScalarGridSpec(
            num_scalar_prefetch=0,
            grid=(B // Bt,),
            in_specs=[state_spec, wz_spec, whx_spec],
            out_specs=state_spec),
        compiler_params=pltpu.CompilerParams(
            dimension_semantics=("parallel",),
            vmem_limit_bytes=vmem_limit),
    )(hp, wz_p, whx_p)

    out = out.astype(jnp.float32)
    h_e = out[:, :S, 0 * D:1 * D]
    h_l = out[:, :S, 1 * D:2 * D]
    h_i = out[:, :S, 2 * D:3 * D]
    h_m = out[:, :S, 3 * D:4 * D]
    return h_e, h_m, h_l, h_i


def _forward_multi(h_e0, h_m0, h_l0, h_i0, W_z, W_hx, loop_num, batch_block,
                   vmem_cap, num_tc, io_dtype):
    B, S, D = h_e0.shape
    Sp = _round_up(S, 8)
    Dp = _round_up(D, 128)

    wz_p, whx_p = _build_stacked_weights(W_z, W_hx, D, Dp)

    pad = ((0, 0), (0, Sp - S), (0, Dp - D))
    hs = [jnp.pad(h, pad).astype(io_dtype) for h in (h_e0, h_l0, h_i0, h_m0)]

    per_b = 4 * 40 * Sp * Dp
    Bt = batch_block if batch_block is not None else _choose_batch_block(
        B, Sp, per_b, vmem_cap, num_tc)
    assert B % Bt == 0, "batch must be divisible by the batch block"

    state_block_bytes = 4 * Bt * Sp * Dp * jnp.dtype(io_dtype).itemsize
    weight_bytes = (wz_p.size + whx_p.size) * 2
    vmem_limit = _vmem_limit(state_block_bytes, weight_bytes, vmem_cap)

    state_spec = pl.BlockSpec((Bt, Sp, Dp), lambda b: (b, 0, 0))
    wz_spec = pl.BlockSpec((4, Dp, 2 * Dp), lambda b: (0, 0, 0))
    whx_spec = pl.BlockSpec((4, 2 * Dp, Dp), lambda b: (0, 0, 0))
    out_sd = jax.ShapeDtypeStruct((B, Sp, Dp), io_dtype)

    outs = pl.pallas_call(
        functools.partial(tggann_multi_kernel, loop_num=loop_num),
        out_shape=(out_sd,) * 4,   # h_e, h_l, h_i, h_m
        grid_spec=pltpu.PrefetchScalarGridSpec(
            num_scalar_prefetch=0,
            grid=(B // Bt,),
            in_specs=[state_spec] * 4 + [wz_spec, whx_spec],
            out_specs=[state_spec] * 4),
        compiler_params=pltpu.CompilerParams(
            dimension_semantics=("parallel",),
            vmem_limit_bytes=vmem_limit),
    )(hs[0], hs[1], hs[2], hs[3], wz_p, whx_p)

    h_e, h_l, h_i, h_m = (o[:, :S, :D].astype(jnp.float32) for o in outs)
    return h_e, h_m, h_l, h_i


def tggann_forward(enc_med, enc_inputs, enc_lab, decay_mask_lower, time, lengths,
                   h_e0, h_m0, h_l0, h_i0, W_out, W_z, W_hx, *, loop_num,
                   batch_block=None, state_io_dtype=jnp.float32):
    # basic=True path: enc_*, decay_mask_lower, time, lengths and W_out only feed
    # dead code in the reference forward (the h_*_r_c tensors are never read),
    # so they never reach the kernel.
    del enc_med, enc_inputs, enc_lab, decay_mask_lower, time, lengths, W_out

    h_e0 = jnp.asarray(h_e0, jnp.float32)
    h_m0 = jnp.asarray(h_m0, jnp.float32)
    h_l0 = jnp.asarray(h_l0, jnp.float32)
    h_i0 = jnp.asarray(h_i0, jnp.float32)
    assert h_e0.shape == h_m0.shape == h_l0.shape == h_i0.shape, \
        "this kernel requires all four hidden states to share a shape (seq == dim_embd)"
    W_z = jnp.asarray(W_z, jnp.float32)
    W_hx = jnp.asarray(W_hx, jnp.float32)
    _, _, D = h_e0.shape

    vmem_cap = _vmem_capacity_bytes()
    num_tc = _num_tensorcores_per_chip()

    args = (h_e0, h_m0, h_l0, h_i0, W_z, W_hx, loop_num, batch_block,
            vmem_cap, num_tc, state_io_dtype)
    if 4 * D <= 128:
        return _forward_packed(*args)
    # TODO(synk): shapes with 4*dim_embd > 128 use the per-node-type fallback kernel.
    return _forward_multi(*args)


# -----------------------------------------------------------------------------
# Pure-JAX references
# -----------------------------------------------------------------------------
def tggann_reference_fp32(h_e, h_m, h_l, h_i, W_z, W_hx, loop_num):
    """Float32 mirror of the PyTorch forward (basic=True), batched."""
    D = h_e.shape[-1]
    for _ in range(loop_num):
        outs_e = jax.nn.sigmoid(jnp.concatenate([h_e, h_e], -1) @ W_z[3])
        outs_l = jax.nn.sigmoid(jnp.concatenate([h_l, h_l], -1) @ W_z[0])
        outs_i = jax.nn.sigmoid(jnp.concatenate([h_i, h_i], -1) @ W_z[1])
        outs_m = jax.nn.sigmoid(jnp.concatenate([h_m, h_m], -1) @ W_z[2])
        r_e, z_e = outs_e[..., :D], outs_e[..., D:]
        r_l, z_l = outs_l[..., :D], outs_l[..., D:]
        r_i, z_i = outs_i[..., :D], outs_i[..., D:]
        r_m, z_m = outs_m[..., :D], outs_m[..., D:]
        h_e_ = jnp.tanh((r_e * h_e) @ W_hx[0] + h_e @ W_hx[1])
        h_l_ = jnp.tanh((r_l * h_l) @ W_hx[2] + h_l @ W_hx[3])
        h_i_ = jnp.tanh((r_i * h_i) @ W_hx[4] + h_i @ W_hx[5])
        h_m_ = jnp.tanh((r_m * h_m) @ W_hx[6] + h_m @ W_hx[7])
        h_e = (1.0 - z_e) * h_e + z_e * jnp.tanh(h_e_)
        h_l = (1.0 - z_l) * h_l + z_l * jnp.tanh(h_l_)
        h_m = (1.0 - z_m) * h_m + z_m * jnp.tanh(h_m_)
        h_i = (1.0 - z_i) * h_i + z_i * jnp.tanh(h_i_)
    return h_e, h_m, h_l, h_i


def tggann_reference_kernel_numerics(h_e, h_m, h_l, h_i, W_z, W_hx, loop_num):
    """Mirror of the kernel numerics: folded bf16 gates, fused bf16 candidate,
    f32 accumulation, hoisted bf16 cast and h + z*(tanh(c) - h) blend."""
    D = h_e.shape[-1]
    bf16 = jnp.bfloat16
    f32 = jnp.float32
    wz_fold = _fold_gates(W_z, D).astype(bf16)
    whx = W_hx.astype(bf16)

    def cell(h, t):
        h_bf = h.astype(bf16)
        gate = jax.nn.sigmoid(
            jnp.dot(h_bf, wz_fold[_ZIDX[t]], preferred_element_type=f32))
        r, z = gate[..., :D], gate[..., D:]
        cand = jnp.concatenate([(r * h).astype(bf16), h_bf], -1)
        wcat = jnp.concatenate([whx[2 * t], whx[2 * t + 1]], 0)
        h_cand = jnp.tanh(jnp.dot(cand, wcat, preferred_element_type=f32))
        return h + z * (jnp.tanh(h_cand) - h)

    for _ in range(loop_num):
        h_e = cell(h_e, 0)
        h_l = cell(h_l, 1)
        h_i = cell(h_i, 2)
        h_m = cell(h_m, 3)
    return h_e, h_m, h_l, h_i


if __name__ == "__main__":
    B, D = 2, 32          # batch, dim_embd; seq == dim_embd (broadcasting in the model)
    S = D
    LOOP_NUM = 2
    f = jnp.float32

    key = jax.random.PRNGKey(0)
    ks = jax.random.split(key, 12)

    enc_med = jax.random.normal(ks[0], (B, S, D), f)
    enc_inputs = jax.random.normal(ks[1], (B, S, D), f)
    enc_lab = jax.random.normal(ks[2], (B, S, D), f)

    # Nonzero initial hidden states (the forward's optional h_*_r args).
    h_e0 = jax.random.normal(ks[3], (B, S, D), f) * 0.5
    h_m0 = jax.random.normal(ks[4], (B, D, D), f) * 0.5
    h_l0 = jax.random.normal(ks[5], (B, D, D), f) * 0.5
    h_i0 = jax.random.normal(ks[6], (B, D, D), f) * 0.5

    # Deterministic "kaiming-like" parameter init (scaled normals).
    W_out = jax.random.normal(ks[7], (4, D, D), f) * (1.0 / np.sqrt(D))      # dead on basic path
    W_z = jax.random.normal(ks[8], (4, 2 * D, 2 * D), f) * (1.0 / np.sqrt(2 * D))
    # nn.Linear weights in torch (out, in) layout; pre-transpose so the kernel does x @ W.
    W_lin_torch = jax.random.normal(ks[9], (8, D, D), f) * (1.0 / np.sqrt(D))
    W_hx = jnp.transpose(W_lin_torch, (0, 2, 1))

    # Unused (basic=True) extra forward args, kept for signature fidelity.
    decay_mask_lower = jnp.ones((B, S, 1), f)
    time = jnp.zeros((B, S), f)
    lengths = jnp.full((B,), S, jnp.int32)

    outs = tggann_forward(enc_med, enc_inputs, enc_lab, decay_mask_lower, time,
                          lengths, h_e0, h_m0, h_l0, h_i0, W_out, W_z, W_hx,
                          loop_num=LOOP_NUM)
    outs = jax.block_until_ready(outs)

    # (1) Tight check against a pure-JAX mirror of the kernel numerics.
    mirror = tggann_reference_kernel_numerics(h_e0, h_m0, h_l0, h_i0, W_z, W_hx, LOOP_NUM)
    for got, ref in zip(outs, mirror):
        np.testing.assert_allclose(np.asarray(got), np.asarray(ref),
                                   rtol=2e-3, atol=2e-3)

    # (2) Sanity check against the original full-f32 formulation (bf16 MXU
    #     operands introduce ~1e-2-level differences, hence the loose bound).
    refs = tggann_reference_fp32(h_e0, h_m0, h_l0, h_i0, W_z, W_hx, LOOP_NUM)
    for got, ref in zip(outs, refs):
        np.testing.assert_allclose(np.asarray(got), np.asarray(ref),
                                   rtol=1e-1, atol=1e-1)

    print("KERNEL_OK")
</pallas_src>

<mosaic_0001>
module attributes {stable_mosaic.version = 11 : i64} {
  func.func @tggann_packed_kernel(%arg0: i32, %arg1: memref<2x32x128xf32, #tpu.memory_space<vmem>>, %arg2: memref<128x256xbf16, #tpu.memory_space<vmem>>, %arg3: memref<256x128xbf16, #tpu.memory_space<vmem>>, %arg4: memref<2x32x128xf32, #tpu.memory_space<vmem>>) attributes {dimension_semantics = [#tpu.dimension_semantics<parallel>], iteration_bounds = array<i64: 1>, scalar_prefetch = 0 : i64, scratch_operands = 0 : i64, tpu.core_type = #tpu.core_type<tc>, window_params = [{transform_indices = @transform_0, window_bounds = array<i64: 2, 32, 128>}, {pipeline_mode = #tpu.pipeline_mode<synchronous>, transform_indices = @transform_1, window_bounds = array<i64: 128, 256>}, {pipeline_mode = #tpu.pipeline_mode<synchronous>, transform_indices = @transform_2, window_bounds = array<i64: 256, 128>}, {transform_indices = @transform_3, window_bounds = array<i64: 2, 32, 128>}]} {
    %c0 = arith.constant 0 : index
    %c0_0 = arith.constant 0 : index
    %c0_1 = arith.constant 0 : index
    %0 = vector.load %arg1[%c0, %c0_0, %c0_1] : memref<2x32x128xf32, #tpu.memory_space<vmem>>, vector<2x32x128xf32>
    %1 = vector.shape_cast %0 : vector<2x32x128xf32> to vector<64x128xf32>
    %2 = arith.truncf %1 : vector<64x128xf32> to vector<64x128xbf16>
    %c0_2 = arith.constant 0 : index
    %c0_3 = arith.constant 0 : index
    %3 = vector.load %arg2[%c0_2, %c0_3] : memref<128x256xbf16, #tpu.memory_space<vmem>>, vector<128x256xbf16>
    %cst = arith.constant dense<0.000000e+00> : vector<64x256xf32>
    %4 = tpu.matmul %2, %3, %cst {dimension_numbers = #tpu.dot_dimension_numbers<[1], [0], [0], [1], [0, 0, 1, 1], [], []>} : vector<64x128xbf16>, vector<128x256xbf16>, vector<64x256xf32> -> vector<64x256xf32>
    %5 = arith.negf %4 : vector<64x256xf32>
    %6 = math.exp %5 : vector<64x256xf32>
    %cst_4 = arith.constant 1.000000e+00 : f32
    %7 = vector.broadcast %cst_4 : f32 to vector<64x256xf32>
    %8 = arith.addf %7, %6 : vector<64x256xf32>
    %9 = arith.divf %7, %8 : vector<64x256xf32>
    %10 = vector.extract_strided_slice %9 {offsets = [0, 0], sizes = [64, 128], strides = [1, 1]} : vector<64x256xf32> to vector<64x128xf32>
    %11 = vector.extract_strided_slice %9 {offsets = [0, 128], sizes = [64, 128], strides = [1, 1]} : vector<64x256xf32> to vector<64x128xf32>
    %12 = arith.mulf %10, %1 : vector<64x128xf32>
    %13 = arith.truncf %12 : vector<64x128xf32> to vector<64x128xbf16>
    %14 = tpu.concatenate %13, %2 in 1 : vector<64x128xbf16>, vector<64x128xbf16> -> vector<64x256xbf16>
    %c0_5 = arith.constant 0 : index
    %c0_6 = arith.constant 0 : index
    %15 = vector.load %arg3[%c0_5, %c0_6] : memref<256x128xbf16, #tpu.memory_space<vmem>>, vector<256x128xbf16>
    %cst_7 = arith.constant dense<0.000000e+00> : vector<64x128xf32>
    %16 = tpu.matmul %14, %15, %cst_7 {dimension_numbers = #tpu.dot_dimension_numbers<[1], [0], [0], [1], [0, 0, 1, 1], [], []>} : vector<64x256xbf16>, vector<256x128xbf16>, vector<64x128xf32> -> vector<64x128xf32>
    %17 = math.tanh %16 : vector<64x128xf32>
    %18 = math.tanh %17 : vector<64x128xf32>
    %19 = arith.subf %18, %1 : vector<64x128xf32>
    %20 = arith.mulf %11, %19 : vector<64x128xf32>
    %21 = arith.addf %1, %20 : vector<64x128xf32>
    %22 = arith.truncf %21 : vector<64x128xf32> to vector<64x128xbf16>
    %c0_8 = arith.constant 0 : index
    %c0_9 = arith.constant 0 : index
    %23 = vector.load %arg2[%c0_8, %c0_9] : memref<128x256xbf16, #tpu.memory_space<vmem>>, vector<128x256xbf16>
    %cst_10 = arith.constant dense<0.000000e+00> : vector<64x256xf32>
    %24 = tpu.matmul %22, %23, %cst_10 {dimension_numbers = #tpu.dot_dimension_numbers<[1], [0], [0], [1], [0, 0, 1, 1], [], []>} : vector<64x128xbf16>, vector<128x256xbf16>, vector<64x256xf32> -> vector<64x256xf32>
    %25 = arith.negf %24 : vector<64x256xf32>
    %26 = math.exp %25 : vector<64x256xf32>
    %cst_11 = arith.constant 1.000000e+00 : f32
    %27 = vector.broadcast %cst_11 : f32 to vector<64x256xf32>
    %28 = arith.addf %27, %26 : vector<64x256xf32>
    %29 = arith.divf %27, %28 : vector<64x256xf32>
    %30 = vector.extract_strided_slice %29 {offsets = [0, 0], sizes = [64, 128], strides = [1, 1]} : vector<64x256xf32> to vector<64x128xf32>
    %31 = vector.extract_strided_slice %29 {offsets = [0, 128], sizes = [64, 128], strides = [1, 1]} : vector<64x256xf32> to vector<64x128xf32>
    %32 = arith.mulf %30, %21 : vector<64x128xf32>
    %33 = arith.truncf %32 : vector<64x128xf32> to vector<64x128xbf16>
    %34 = tpu.concatenate %33, %22 in 1 : vector<64x128xbf16>, vector<64x128xbf16> -> vector<64x256xbf16>
    %c0_12 = arith.constant 0 : index
    %c0_13 = arith.constant 0 : index
    %35 = vector.load %arg3[%c0_12, %c0_13] : memref<256x128xbf16, #tpu.memory_space<vmem>>, vector<256x128xbf16>
    %cst_14 = arith.constant dense<0.000000e+00> : vector<64x128xf32>
    %36 = tpu.matmul %34, %35, %cst_14 {dimension_numbers = #tpu.dot_dimension_numbers<[1], [0], [0], [1], [0, 0, 1, 1], [], []>} : vector<64x256xbf16>, vector<256x128xbf16>, vector<64x128xf32> -> vector<64x128xf32>
    %37 = math.tanh %36 : vector<64x128xf32>
    %38 = math.tanh %37 : vector<64x128xf32>
    %39 = arith.subf %38, %21 : vector<64x128xf32>
    %40 = arith.mulf %31, %39 : vector<64x128xf32>
    %41 = arith.addf %21, %40 : vector<64x128xf32>
    %42 = vector.shape_cast %41 : vector<64x128xf32> to vector<2x32x128xf32>
    %c0_15 = arith.constant 0 : index
    %c0_16 = arith.constant 0 : index
    %c0_17 = arith.constant 0 : index
    %43 = vector.load %arg4[%c0_15, %c0_16, %c0_17] : memref<2x32x128xf32, #tpu.memory_space<vmem>>, vector<2x32x128xf32>
    tpu.vector_store %arg4[%c0_15, %c0_16, %c0_17], %42 {strides = array<i32>} : memref<2x32x128xf32, #tpu.memory_space<vmem>>, vector<2x32x128xf32>,
    return
  }
  func.func @transform_0(%arg0: i32) -> (i32, i32, i32) {
    %c0_i32 = arith.constant 0 : i32
    %c0_i32_0 = arith.constant 0 : i32
    %c0_i32_1 = arith.constant 0 : i32
    return %arg0, %c0_i32, %c0_i32_0 : i32, i32, i32
  }
  func.func @transform_1(%arg0: i32) -> (i32, i32) {
    %c0_i32 = arith.constant 0 : i32
    %c0_i32_0 = arith.constant 0 : i32
    %c0_i32_1 = arith.constant 0 : i32
    return %c0_i32, %c0_i32_0 : i32, i32
  }
  func.func @transform_2(%arg0: i32) -> (i32, i32) {
    %c0_i32 = arith.constant 0 : i32
    %c0_i32_0 = arith.constant 0 : i32
    %c0_i32_1 = arith.constant 0 : i32
    return %c0_i32, %c0_i32_0 : i32, i32
  }
  func.func @transform_3(%arg0: i32) -> (i32, i32, i32) {
    %c0_i32 = arith.constant 0 : i32
    %c0_i32_0 = arith.constant 0 : i32
    %c0_i32_1 = arith.constant 0 : i32
    return %arg0, %c0_i32, %c0_i32_0 : i32, i32, i32
  }
}

</mosaic_0001>

<bundles_post_ra>
// kernel: tpu_custom_call.1
= control target key start
LH: loop header
LB: loop body
LE: loop exit
PB: predicated region body
PF: predicated region fallthrough
CT: control target
= control target key end

     0   :  { %8 = vsyncpa [#allocation3], 0  ;;  %s1646_s0 = inlined_call_operand.hbm [shape: f32[2,32,128], index: 0, kind: input, shape index: {}]   ;;  %s1647_s1 = inlined_call_operand.hbm [shape: bf16[128,256], index: 1, kind: input, shape index: {}]   ;;  %s1648_s2 = inlined_call_operand.hbm [shape: bf16[256,128], index: 2, kind: input, shape index: {}]   ;;  %s1649_s3 = inlined_call_operand.hbm [shape: f32[2,32,128], index: 3, kind: output, shape index: {}]  }
   0x1   :  { %9 = vsyncpa [#allocation6], 0 }
   0x2   :  { %10 = vsyncpa [#allocation4], 0  ;;  %s1366_s12 = smov [#allocation5]   ;;  %s1367_s14 = smov [#allocation2]  }
   0x3   :  { %s28_s13 = sshll.u32 %s1366_s12, 4  ;;  %s16_s15 = sshll.u32 %s1367_s14, 4  ;;  %s29_s13 = int_to_ptr.vmem [resolvable:$true] %s28_s13  ;;  %s17_s15 = int_to_ptr.vmem [resolvable:$true] %s16_s15 }
   0x4   :  { %s1288_s16 = scalar_lea.vmem %s29_s13, 2048  ;;  %p1293_p1 = scmp.lt.s32.totalorder %s29_s13, %s29_s13 }
   0x5   :  { %p1289_p0 = scmp.ne.s32.totalorder %s29_s13, %s1288_s16  ;;  %p1294_p2 = scmp.lt.s32.totalorder %s1288_s16, %s1288_s16 }
   0x7   :  { %p1295_p3 = por %p1294_p2, %p1293_p1 }
   0x9   :  { %p1296_p4 = pnand %p1295_p3, %p1289_p0 }
   0xb   :  { %1299 = shalt.err (!%p1296_p4)
}
   0xc   :  { %s1368_s17 = smov 128   ;;  %s1369_s18 = smov 8  }
   0xd   :  { %34 = dma.hbm_to_vmem [thread:$0]  %s1647_s1, 2048, %s29_s13, [#allocation6], %s1368_s17, %s1368_s17, %s1369_s18  }
   0xe   :  { %s1308_s21 = scalar_lea.vmem %s17_s15, 1024  ;;  %p1313_p6 = scmp.lt.s32.totalorder %s17_s15, %s17_s15 }
   0xf   :  { %p1309_p5 = scmp.ne.s32.totalorder %s17_s15, %s1308_s21  ;;  %p1314_p7 = scmp.lt.s32.totalorder %s1308_s21, %s1308_s21 }
  0x11   :  { %p1315_p8 = por %p1314_p7, %p1313_p6 }
  0x13   :  { %p1316_p9 = pnand %p1315_p8, %p1309_p5 }
  0x15   :  { %1319 = shalt.err (!%p1316_p9)
}
  0x16   :  { %22 = dma.hbm_to_vmem [thread:$0]  %s1646_s0, 1024, %s17_s15, [#allocation3], %s1368_s17, %s1368_s17, %s1369_s18  }
  0x17   :  { %s1370_s24 = smov [#allocation7]  }
  0x18   :  { %s40_s25 = sshll.u32 %s1370_s24, 4  ;;  %s41_s25 = int_to_ptr.vmem [resolvable:$true] %s40_s25 }
  0x19   :  { %s1328_s26 = scalar_lea.vmem %s41_s25, 2048  ;;  %p1333_p11 = scmp.lt.s32.totalorder %s41_s25, %s41_s25 }
  0x1a   :  { %p1329_p10 = scmp.ne.s32.totalorder %s41_s25, %s1328_s26  ;;  %p1334_p12 = scmp.lt.s32.totalorder %s1328_s26, %s1328_s26 }
  0x1c   :  { %p1335_p13 = por %p1334_p12, %p1333_p11 }
  0x1e   :  { %p1336_p0 = pnand %p1335_p13, %p1329_p10 }
  0x20   :  { %1339 = shalt.err (!%p1336_p0)
}
  0x21   :  { %s1371_s1 = smov 64   ;;  %s1372_s27 = smov 4  }
  0x22   :  { %46 = dma.hbm_to_vmem [thread:$0]  %s1648_s2, 2048, %s41_s25, [#allocation6], %s1371_s1, %s1371_s1, %s1372_s27  }
  0x23   :  { %1360 = dma.done.wait [#allocation3], 1024  }
  0x24   :  { %1361 = vsyncadd [#allocation3], 4294966272 }
  0x25   :  { %1362 = dma.done.wait [#allocation6], 4096  }
  0x26   :  { %1363 = vsyncadd [#allocation6], 4294963200  ;;  %v1373_v0 = vmov 0   ;;  %v1048_v1 = vld [vmem:[#allocation5 + $0x74] ss:$8 sps:$4 sm:$0xff]   ;;  %v1411_v8 = vld [vmem:[#allocation2] sm:$0xff] }
  0x27   :  { %197 = vmatprep.mubr.bf16.mxu0 %v1373_v0  ;;  %v1050_v2 = vld [vmem:[#allocation5 + $0x70] ss:$8 sps:$4 sm:$0xff]   ;;  %165 = vmatprep.subr.bf16.mxu0 %v1048_v1  ;;  %v1051_v3 = vld [vmem:[#allocation5 + $0x64] ss:$8 sps:$4 sm:$0xff]   ;;  %v1053_v4 = vld [vmem:[#allocation5 + $0x60] ss:$8 sps:$4 sm:$0xff]  }
  0x28   :  { %166 = vmatpush1.bf16.msra.mxu0 %v1050_v2  ;;  %v1054_v5 = vld [vmem:[#allocation5 + $0x54] ss:$8 sps:$4 sm:$0xff]   ;;  %v1056_v6 = vld [vmem:[#allocation5 + $0x50] ss:$8 sps:$4 sm:$0xff]   ;;  %v1057_v7 = vld [vmem:[#allocation5 + $0x44] ss:$8 sps:$4 sm:$0xff]  }
  0x29   :  { %167 = vmatprep.subr.bf16.mxu0 %v1051_v3  ;;  %v1059_v9 = vld [vmem:[#allocation5 + $0x40] ss:$8 sps:$4 sm:$0xff]   ;;  %v1060_v11 = vld [vmem:[#allocation5 + $0x34] ss:$8 sps:$4 sm:$0xff]   ;;  %v1062_v13 = vld [vmem:[#allocation5 + $0x30] ss:$8 sps:$4 sm:$0xff]  }
  0x2a   :  { %v1413_v10 = vld [vmem:[#allocation2 + $0x8] sm:$0xff]  ;;  %v1066_v16 = vld [vmem:[#allocation5 + $0x14] ss:$8 sps:$4 sm:$0xff]   ;;  %v1068_v17 = vld [vmem:[#allocation5 + $0x10] ss:$8 sps:$4 sm:$0xff]   ;;  %s1374_s0 = smov [#allocation8]  }
  0x2b   :  { %v65_v12 = vpack.c.bf16 %v1413_v10, %v1411_v8  ;;  %v1063_v14 = vld [vmem:[#allocation5 + $0x24] ss:$8 sps:$4 sm:$0xff]   ;;  %v1065_v15 = vld [vmem:[#allocation5 + $0x20] ss:$8 sps:$4 sm:$0xff]   ;;  %v1418_v20 = vld [vmem:[#allocation2 + $0x10] sm:$0xff]  ;;  %s882_s2 = sshll.u32 %s1374_s0, 4  ;;  %s883_s2 = int_to_ptr.vmem [resolvable:$true] %s882_s2 }
  0x2c   :  { %168 = vmatpush1.bf16.msra.mxu0 %v1053_v4  ;;  %v1069_v18 = vld [vmem:[#allocation5 + $0x4] ss:$8 sps:$4 sm:$0xff]   ;;  %v1071_v19 = vld [vmem:[#allocation5] ss:$8 sps:$4 sm:$0xff]   ;;  %v1420_v21 = vld [vmem:[#allocation2 + $0x18] sm:$0xff]  ;;  %s1340_s30 = scalar_lea.vmem %s883_s2, 1024  ;;  %p1345_p2 = scmp.lt.s32.totalorder %s883_s2, %s883_s2 }
  0x2d   :  { %169 = vmatprep.subr.bf16.mxu0 %v1054_v5  ;;  %506 = vmatprep.mubr.bf16.mxu1 %v65_v12  ;;  %v1424_v22 = vpack.c.bf16 %v1420_v21, %v1418_v20  ;;  %v1428_v23 = vld [vmem:[#allocation2 + $0x20] sm:$0xff]  ;;  %v1430_v24 = vld [vmem:[#allocation2 + $0x28] sm:$0xff]  ;;  %v1438_v26 = vld [vmem:[#allocation2 + $0x30] sm:$0xff]  ;;  %p1341_p1 = scmp.ne.s32.totalorder %s883_s2, %s1340_s30  ;;  %p1346_p3 = scmp.lt.s32.totalorder %s1340_s30, %s1340_s30 }
  0x2e   :  { %v1434_v25 = vpack.c.bf16 %v1430_v24, %v1428_v23  ;;  %v1440_v27 = vld [vmem:[#allocation2 + $0x38] sm:$0xff]  ;;  %v1451_v31 = vld [vmem:[#allocation7 + $0x70] sm:$0xff]   ;;  %v1457_v33 = vld [vmem:[#allocation7 + $0x68] sm:$0xff]  }
  0x2f   :  { %v1444_v28 = vpack.c.bf16 %v1440_v27, %v1438_v26  ;;  %v1072_v29 = vld [vmem:[#allocation7 + $0x78] sm:$0xff]   ;;  %v1453_v32 = vld [vmem:[#allocation7 + $0x30] sm:$0xff]   ;;  %v1459_v34 = vld [vmem:[#allocation7 + $0x28] sm:$0xff]   ;;  %p1347_p4 = por %p1346_p3, %p1345_p2 }
  0x30   :  { %170 = vmatpush1.bf16.msra.mxu0 %v1056_v6  ;;  %v1448_v30 = vld [vmem:[#allocation7 + $0x38] sm:$0xff]   ;;  %959 = vmatprep.subr.bf16.mxu1 %v1072_v29  ;;  %v1463_v35 = vld [vmem:[#allocation7 + $0x60] sm:$0xff]   ;;  %v1475_v39 = vld [vmem:[#allocation7 + $0x50] sm:$0xff]  }
  0x31   :  { %171 = vmatprep.subr.bf16.mxu0 %v1057_v7  ;;  %960 = vmatpush3.bf16.msra.mxu1 %v1448_v30  ;;  %v1465_v36 = vld [vmem:[#allocation7 + $0x20] sm:$0xff]   ;;  %v1469_v37 = vld [vmem:[#allocation7 + $0x58] sm:$0xff]   ;;  %v1477_v40 = vld [vmem:[#allocation7 + $0x10] sm:$0xff]   ;;  %p1348_p5 = pnand %p1347_p4, %p1341_p1 }
  0x32   :  { %961 = vmatprep.subr.bf16.mxu1 %v1451_v31  ;;  %v1471_v38 = vld [vmem:[#allocation7 + $0x18] sm:$0xff]   ;;  %v1481_v41 = vld [vmem:[#allocation7 + $0x48] sm:$0xff]   ;;  %v1487_v43 = vld [vmem:[#allocation7 + $0x40] sm:$0xff]  }
  0x33   :  { %v1483_v42 = vld [vmem:[#allocation7 + $0x8] sm:$0xff]   ;;  %v1489_v44 = vld [vmem:[#allocation7] sm:$0xff]  }
  0x34   :  { %172 = vmatpush1.bf16.msra.mxu0 %v1059_v9 }
  0x35   :  { %173 = vmatprep.subr.bf16.mxu0 %v1060_v11  ;;  %962 = vmatpush3.bf16.msra.mxu1 %v1453_v32 }
  0x36   :  { %963 = vmatprep.subr.bf16.mxu1 %v1457_v33 }
  0x38   :  { %174 = vmatpush1.bf16.msra.mxu0 %v1062_v13 }
  0x39   :  { %175 = vmatprep.subr.bf16.mxu0 %v1063_v14  ;;  %964 = vmatpush3.bf16.msra.mxu1 %v1459_v34 }
  0x3a   :  { %965 = vmatprep.subr.bf16.mxu1 %v1463_v35 }
  0x3c   :  { %176 = vmatpush1.bf16.msra.mxu0 %v1065_v15 }
  0x3d   :  { %177 = vmatprep.subr.bf16.mxu0 %v1066_v16  ;;  %966 = vmatpush3.bf16.msra.mxu1 %v1465_v36 }
  0x3e   :  { %967 = vmatprep.subr.bf16.mxu1 %v1469_v37 }
  0x40   :  { %178 = vmatpush1.bf16.msra.mxu0 %v1068_v17 }
  0x41   :  { %179 = vmatprep.subr.bf16.mxu0 %v1069_v18  ;;  %968 = vmatpush3.bf16.msra.mxu1 %v1471_v38 }
  0x42   :  { %969 = vmatprep.subr.bf16.mxu1 %v1475_v39 }
  0x44   :  { %180 = vmatpush1.bf16.msra.mxu0 %v1071_v19 }
  0x45   :  { %583 = vmatprep.subr.bf16.mxu0 %v1048_v1  ;;  %970 = vmatpush3.bf16.msra.mxu1 %v1477_v40 }
  0x46   :  { %971 = vmatprep.subr.bf16.mxu1 %v1481_v41 }
  0x47   :  { %198 = vmatmul.mubr.bf16.vlgmr.msra.gmra.mxu0 %v65_v12 }
  0x48   :  { %207 = vmatprep.mubr.bf16.mxu0 %v1373_v0  ;;  %584 = vmatpush1.bf16.msra.mxu0 %v1050_v2 }
  0x49   :  { %585 = vmatprep.subr.bf16.mxu0 %v1051_v3  ;;  %972 = vmatpush3.bf16.msra.mxu1 %v1483_v42 }
  0x4a   :  { %973 = vmatprep.subr.bf16.mxu1 %v1487_v43 }
  0x4c   :  { %586 = vmatpush1.bf16.msra.mxu0 %v1053_v4 }
  0x4d   :  { %587 = vmatprep.subr.bf16.mxu0 %v1054_v5  ;;  %974 = vmatpush3.bf16.msra.mxu1 %v1489_v44 }
  0x4e   :  { %999 = vmatprep.subr.bf16.mxu1 %v1072_v29 }
  0x4f   :  { %208 = vmatmul.mubr.bf16.gmra.mxu0 %v1424_v22 }
  0x50   :  { %217 = vmatprep.mubr.bf16.mxu0 %v1373_v0  ;;  %588 = vmatpush1.bf16.msra.mxu0 %v1056_v6 }
  0x51   :  { %589 = vmatprep.subr.bf16.mxu0 %v1057_v7 }
  0x54   :  { %590 = vmatpush1.bf16.msra.mxu0 %v1059_v9 }
  0x55   :  { %591 = vmatprep.subr.bf16.mxu0 %v1060_v11 }
  0x57   :  { %218 = vmatmul.mubr.bf16.gmra.mxu0 %v1434_v25 }
  0x58   :  { %227 = vmatprep.mubr.bf16.mxu0 %v1373_v0  ;;  %592 = vmatpush1.bf16.msra.mxu0 %v1062_v13 }
  0x59   :  { %593 = vmatprep.subr.bf16.mxu0 %v1063_v14 }
  0x5c   :  { %594 = vmatpush1.bf16.msra.mxu0 %v1065_v15 }
  0x5d   :  { %595 = vmatprep.subr.bf16.mxu0 %v1066_v16 }
  0x5f   :  { %228 = vmatmul.mubr.bf16.gmra.mxu0 %v1444_v28 }
  0x60   :  { %596 = vmatpush1.bf16.msra.mxu0 %v1068_v17  ;;  %615 = vmatprep.mubr.bf16.mxu0 %v1373_v0 }
  0x61   :  { %597 = vmatprep.subr.bf16.mxu0 %v1069_v18 }
  0x64   :  { %598 = vmatpush1.bf16.msra.mxu0 %v1071_v19 }
 0x107   :  { %v199_v45 = vpop.f32.mrf.mxu0 }
 0x108   :  { %v911_v46 = vmul.f32 -1.442695, %v199_v45 }
 0x109   :  { %v1493_v47 = vpop.f32.mrf.mxu0 }
 0x10a   :  { %1088 = vpow2.f32 %v911_v46 }
 0x10b   :  { %v203_v48 = vpop.f32.mrf.mxu0 }
 0x10c   :  { %v913_v49 = vmul.f32 -1.442695, %v203_v48 }
 0x10d   :  { %v1495_v50 = vpop.f32.mrf.mxu0 }
 0x10e   :  { %1090 = vpow2.f32 %v913_v49 }
 0x10f   :  { %v209_v51 = vpop.f32.mrf.mxu0 }
 0x110   :  { %v915_v52 = vmul.f32 -1.442695, %v209_v51 }
 0x111   :  { %v1497_v53 = vpop.f32.mrf.mxu0 }
 0x112   :  { %1092 = vpow2.f32 %v915_v52 }
 0x113   :  { %v213_v54 = vpop.f32.mrf.mxu0 }
 0x114   :  { %v917_v55 = vmul.f32 -1.442695, %v213_v54 }
 0x115   :  { %v1499_v56 = vpop.f32.mrf.mxu0 }
 0x116   :  { %1094 = vpow2.f32 %v917_v55 }
 0x117   :  { %v1089_v57 = vpop.eup %1088  ;;  %v219_v58 = vpop.f32.mrf.mxu0 }
 0x118   :  { %v286_v59 = vadd.f32 1.0, %v1089_v57  ;;  %v919_v60 = vmul.f32 -1.442695, %v219_v58 }
 0x119   :  { %v1501_v61 = vpop.f32.mrf.mxu0 }
 0x11a   :  { %1096 = vpow2.f32 %v919_v60 }
 0x11b   :  { %v1091_v62 = vpop.eup %1090  ;;  %v223_v63 = vpop.f32.mrf.mxu0  ;;  %1098 = vrcp.f32 %v286_v59 }
 0x11c   :  { %v288_v1 = vadd.f32 1.0, %v1091_v62  ;;  %v921_v2 = vmul.f32 -1.442695, %v223_v63 }
 0x11d   :  { %v1503_v3 = vpop.f32.mrf.mxu0 }
 0x11e   :  { %1100 = vrcp.f32 %v288_v1 }
 0x11f   :  { %v1093_v4 = vpop.eup %1092  ;;  %1102 = vpow2.f32 %v921_v2  ;;  %v229_v5 = vpop.f32.mrf.mxu0 }
 0x120   :  { %v290_v6 = vadd.f32 1.0, %v1093_v4  ;;  %v923_v7 = vmul.f32 -1.442695, %v229_v5  ;;  %v920_v5 = vmul.f32 -1.442695, %v1501_v61 }
 0x121   :  { %v1505_v9 = vpop.f32.mrf.mxu0 }
 0x122   :  { %1104 = vpow2.f32 %v923_v7 }
 0x123   :  { %v1095_v11 = vpop.eup %1094  ;;  %v233_v12 = vpop.f32.mrf.mxu0  ;;  %1106 = vrcp.f32 %v290_v6 }
 0x124   :  { %v292_v13 = vadd.f32 1.0, %v1095_v11  ;;  %v925_v14 = vmul.f32 -1.442695, %v233_v12  ;;  %v922_v12 = vmul.f32 -1.442695, %v1503_v3 }
 0x126   :  { %1108 = vrcp.f32 %v292_v13 }
 0x127   :  { %1110 = vpow2.f32 %v925_v14  ;;  %v1097_v15 = vpop.eup %1096 }
 0x128   :  { %v1099_v16 = vpop.eup %1098  ;;  %v294_v17 = vadd.f32 1.0, %v1097_v15 }
 0x129   :  { %v334_v29 = vmul.f32 %v1099_v16, %v1411_v8 }
 0x12a   :  { %1112 = vrcp.f32 %v294_v17 }
 0x12b   :  { %v1101_v18 = vpop.eup %1100 }
 0x12c   :  { %v1103_v19 = vpop.eup %1102  ;;  %v335_v45 = vmul.f32 %v1101_v18, %v1413_v10  ;;  %v924_v18 = vmul.f32 -1.442695, %v1505_v9 }
 0x12d   :  { %v296_v46 = vadd.f32 1.0, %v1103_v19 }
 0x12e   :  { %v342_v48 = vpack.c.bf16 %v335_v45, %v334_v29  ;;  %v235_v29 = vpop.f32.mrf.mxu0 }
 0x12f   :  { %1114 = vrcp.f32 %v296_v46  ;;  %v1105_v49 = vpop.eup %1104 }
 0x130   :  { %507 = vmatmul.mubr.bf16.vlgmr.msra.gmra.mxu1 %v342_v48  ;;  %v1107_v51 = vpop.eup %1106  ;;  %v298_v52 = vadd.f32 1.0, %v1105_v49  ;;  %v926_v49 = vmul.f32 -1.442695, %v235_v29 }
 0x131   :  { %514 = vmatprep.mubr.bf16.mxu1 %v1424_v22  ;;  %1000 = vmatpush3.bf16.msra.mxu1 %v1448_v30  ;;  %v336_v57 = vmul.f32 %v1107_v51, %v1418_v20 }
 0x132   :  { %1001 = vmatprep.subr.bf16.mxu1 %v1451_v31  ;;  %1116 = vrcp.f32 %v298_v52 }
 0x133   :  { %v1109_v54 = vpop.eup %1108 }
 0x134   :  { %v1111_v55 = vpop.eup %1110  ;;  %v337_v58 = vmul.f32 %v1109_v54, %v1420_v21 }
 0x135   :  { %v300_v59 = vadd.f32 1.0, %v1111_v55  ;;  %1002 = vmatpush3.bf16.msra.mxu1 %v1453_v32 }
 0x136   :  { %v343_v60 = vpack.c.bf16 %v337_v58, %v336_v57  ;;  %1003 = vmatprep.subr.bf16.mxu1 %v1457_v33 }
 0x137   :  { %1118 = vrcp.f32 %v300_v59  ;;  %v1113_v22 = vpop.eup %1112 }
 0x138   :  { %515 = vmatmul.mubr.bf16.gmra.mxu1 %v343_v60  ;;  %v338_v31 = vmul.f32 %v1113_v22, %v1428_v23 }
 0x139   :  { %522 = vmatprep.mubr.bf16.mxu1 %v1434_v25  ;;  %1004 = vmatpush3.bf16.msra.mxu1 %v1459_v34 }
 0x13a   :  { %1005 = vmatprep.subr.bf16.mxu1 %v1463_v35 }
 0x13c   :  { %v1115_v30 = vpop.eup %1114 }
 0x13d   :  { %v339_v62 = vmul.f32 %v1115_v30, %v1430_v24  ;;  %1006 = vmatpush3.bf16.msra.mxu1 %v1465_v36  ;;  %v914_v36 = vmul.f32 -1.442695, %v1495_v50 }
 0x13e   :  { %1007 = vmatprep.subr.bf16.mxu1 %v1469_v37 }
 0x13f   :  { %v344_v32 = vpack.c.bf16 %v339_v62, %v338_v31  ;;  %v1117_v33 = vpop.eup %1116 }
 0x140   :  { %v340_v34 = vmul.f32 %v1117_v33, %v1438_v26 }
 0x141   :  { %523 = vmatmul.mubr.bf16.gmra.mxu1 %v344_v32 }
 0x142   :  { %530 = vmatprep.mubr.bf16.mxu1 %v1444_v28  ;;  %1008 = vmatpush3.bf16.msra.mxu1 %v1471_v38  ;;  %v912_v28 = vmul.f32 -1.442695, %v1493_v47 }
 0x143   :  { %1009 = vmatprep.subr.bf16.mxu1 %v1475_v39 }
 0x144   :  { %v1119_v25 = vpop.eup %1118  ;;  %1120 = vpow2.f32 %v912_v28 }
 0x145   :  { %v341_v35 = vmul.f32 %v1119_v25, %v1440_v27  ;;  %1122 = vpow2.f32 %v914_v36 }
 0x146   :  { %1010 = vmatpush3.bf16.msra.mxu1 %v1477_v40  ;;  %v916_v40 = vmul.f32 -1.442695, %v1497_v53 }
 0x147   :  { %v345_v63 = vpack.c.bf16 %v341_v35, %v340_v34  ;;  %1011 = vmatprep.subr.bf16.mxu1 %v1481_v41 }
 0x149   :  { %531 = vmatmul.mubr.bf16.gmra.mxu1 %v345_v63 }
 0x14a   :  { %1012 = vmatpush3.bf16.msra.mxu1 %v1483_v42  ;;  %v918_v42 = vmul.f32 -1.442695, %v1499_v56 }
 0x14b   :  { %1013 = vmatprep.subr.bf16.mxu1 %v1487_v43 }
 0x14e   :  { %1014 = vmatpush3.bf16.msra.mxu1 %v1489_v44 }
 0x151   :  { %v1121_v50 = vpop.eup %1120 }
 0x152   :  { %v287_v53 = vadd.f32 1.0, %v1121_v50  ;;  %v1123_v11 = vpop.eup %1122 }
 0x153   :  { %v289_v15 = vadd.f32 1.0, %v1123_v11 }
 0x1f0   :  { %v975_v37 = vpop.f32.mrf.mxu1 }
 0x1f2   :  { %v976_v38 = vpop.f32.mrf.mxu1 }
 0x1f3   :  { %v977_v39 = vadd.f32 %v976_v38, %v975_v37 }
 0x1f4   :  { %v978_v1 = vpop.f32.mrf.mxu1 }
 0x1f5   :  { %1124 = vtanh.f32 %v977_v39 }
 0x1f6   :  { %v979_v41 = vpop.f32.mrf.mxu1  ;;  %1126 = vpow2.f32 %v916_v40 }
 0x1f7   :  { %v980_v2 = vadd.f32 %v979_v41, %v978_v1 }
 0x1f8   :  { %v981_v43 = vpop.f32.mrf.mxu1 }
 0x1f9   :  { %1128 = vtanh.f32 %v980_v2 }
 0x1fa   :  { %v982_v44 = vpop.f32.mrf.mxu1  ;;  %1130 = vpow2.f32 %v918_v42 }
 0x1fb   :  { %v983_v47 = vadd.f32 %v982_v44, %v981_v43 }
 0x1fc   :  { %v984_v4 = vpop.f32.mrf.mxu1 }
 0x1fd   :  { %1132 = vtanh.f32 %v983_v47 }
 0x1fe   :  { %v985_v6 = vpop.f32.mrf.mxu1 }
 0x1ff   :  { %v986_v7 = vadd.f32 %v985_v6, %v984_v4 }
 0x201   :  { %1134 = vtanh.f32 %v986_v7  ;;  %v987_v13 = vpop.f32.mrf.mxu1 }
 0x202   :  { %v1125_v14 = vpop.eup %1124  ;;  %1136 = vpow2.f32 %v920_v5 }
 0x203   :  { %1138 = vtanh.f32 %v1125_v14  ;;  %v988_v56 = vpop.f32.mrf.mxu1  ;;  %v1127_v17 = vpop.eup %1126 }
 0x204   :  { %1140 = vrcp.f32 %v287_v53  ;;  %v989_v16 = vadd.f32 %v988_v56, %v987_v13  ;;  %v291_v3 = vadd.f32 1.0, %v1127_v17 }
 0x205   :  { %1142 = vpow2.f32 %v922_v12  ;;  %v990_v61 = vpop.f32.mrf.mxu1 }
 0x206   :  { %v1129_v19 = vpop.eup %1128  ;;  %1144 = vtanh.f32 %v989_v16 }
 0x207   :  { %1146 = vtanh.f32 %v1129_v19  ;;  %v991_v45 = vpop.f32.mrf.mxu1  ;;  %v1131_v48 = vpop.eup %1130 }
 0x208   :  { %1148 = vrcp.f32 %v289_v15  ;;  %v992_v46 = vadd.f32 %v991_v45, %v990_v61  ;;  %v293_v9 = vadd.f32 1.0, %v1131_v48 }
 0x209   :  { %1150 = vpow2.f32 %v924_v18  ;;  %v993_v51 = vpop.f32.mrf.mxu1 }
 0x20a   :  { %v1133_v52 = vpop.eup %1132  ;;  %1152 = vtanh.f32 %v992_v46 }
 0x20b   :  { %1154 = vtanh.f32 %v1133_v52  ;;  %v994_v54 = vpop.f32.mrf.mxu1 }
 0x20c   :  { %1156 = vrcp.f32 %v291_v3  ;;  %v995_v55 = vadd.f32 %v994_v54, %v993_v51 }
 0x20d   :  { %1158 = vpow2.f32 %v926_v49  ;;  %v996_v57 = vpop.f32.mrf.mxu1 }
 0x20e   :  { %v1135_v58 = vpop.eup %1134  ;;  %1160 = vtanh.f32 %v995_v55 }
 0x20f   :  { %v1137_v59 = vpop.eup %1136  ;;  %1162 = vtanh.f32 %v1135_v58  ;;  %v997_v60 = vpop.f32.mrf.mxu1 }
 0x210   :  { %v1139_v22 = vpop.eup %1138  ;;  %v998_v30 = vadd.f32 %v997_v60, %v996_v57  ;;  %1164 = vrcp.f32 %v293_v9  ;;  %v295_v25 = vadd.f32 1.0, %v1137_v59 }
 0x211   :  { %v1141_v31 = vpop.eup %1140  ;;  %v555_v62 = vsub.f32 %v1139_v22, %v1411_v8 }
 0x212   :  { %v1143_v32 = vpop.eup %1142  ;;  %1166 = vtanh.f32 %v998_v30 }
 0x213   :  { %v1145_v33 = vpop.eup %1144  ;;  %v563_v63 = vmul.f32 %v1141_v31, %v555_v62  ;;  %v297_v37 = vadd.f32 1.0, %v1143_v32 }
 0x214   :  { %v1147_v34 = vpop.eup %1146  ;;  %1168 = vtanh.f32 %v1145_v33 }
 0x215   :  { %v1149_v35 = vpop.eup %1148  ;;  %v556_v28 = vsub.f32 %v1147_v34, %v1413_v10  ;;  %1170 = vrcp.f32 %v295_v25  ;;  %v1543_v41 = vadd.f32 %v563_v63, %v1411_v8 }
 0x216   :  { %v1151_v36 = vpop.eup %1150 }
 0x217   :  { %v1153_v38 = vpop.eup %1152  ;;  %v564_v39 = vmul.f32 %v1149_v35, %v556_v28  ;;  %v299_v47 = vadd.f32 1.0, %v1151_v36 }
 0x218   :  { %v1155_v40 = vpop.eup %1154  ;;  %1172 = vtanh.f32 %v1153_v38 }
 0x219   :  { %v1157_v1 = vpop.eup %1156  ;;  %v1546_v2 = vadd.f32 %v564_v39, %v1413_v10  ;;  %v557_v42 = vsub.f32 %v1155_v40, %v1418_v20  ;;  %1174 = vrcp.f32 %v297_v37 }
 0x21a   :  { %v1159_v43 = vpop.eup %1158 }
 0x21b   :  { %v1161_v44 = vpop.eup %1160  ;;  %v579_v4 = vpack.c.bf16 %v1546_v2, %v1543_v41  ;;  %v565_v8 = vmul.f32 %v1157_v1, %v557_v42  ;;  %v301_v7 = vadd.f32 1.0, %v1159_v43 }
 0x21c   :  { %v1163_v50 = vpop.eup %1162  ;;  %1176 = vtanh.f32 %v1161_v44 }
 0x21d   :  { %616 = vmatmul.mubr.bf16.vlgmr.msra.gmra.mxu0 %v579_v4  ;;  %796 = vmatprep.mubr.bf16.mxu1 %v579_v4  ;;  %v558_v5 = vsub.f32 %v1163_v50, %v1420_v21  ;;  %v1165_v6 = vpop.eup %1164  ;;  %1178 = vrcp.f32 %v299_v47  ;;  %v1554_v12 = vadd.f32 %v565_v8, %v1418_v20 }
 0x21e   :  { %625 = vmatprep.mubr.bf16.mxu0 %v1373_v0 }
 0x21f   :  { %v1167_v10 = vpop.eup %1166  ;;  %v566_v53 = vmul.f32 %v1165_v6, %v558_v5 }
 0x220   :  { %1180 = vtanh.f32 %v1167_v10 }
 0x221   :  { %v1169_v11 = vpop.eup %1168  ;;  %v1557_v13 = vadd.f32 %v566_v53, %v1420_v21  ;;  %1182 = vrcp.f32 %v301_v7 }
 0x222   :  { %v559_v14 = vsub.f32 %v1169_v11, %v1428_v23  ;;  %v1171_v15 = vpop.eup %1170 }
 0x223   :  { %v1562_v56 = vpack.c.bf16 %v1557_v13, %v1554_v12 }
 0x224   :  { %v567_v20 = vmul.f32 %v1171_v15, %v559_v14 }
 0x225   :  { %v1173_v16 = vpop.eup %1172  ;;  %626 = vmatmul.mubr.bf16.gmra.mxu0 %v1562_v56 }
 0x226   :  { %635 = vmatprep.mubr.bf16.mxu0 %v1373_v0  ;;  %v560_v17 = vsub.f32 %v1173_v16, %v1430_v24  ;;  %v1175_v18 = vpop.eup %1174  ;;  %v1568_v19 = vadd.f32 %v567_v20, %v1428_v23 }
 0x228   :  { %v568_v61 = vmul.f32 %v1175_v18, %v560_v17 }
 0x229   :  { %v1177_v21 = vpop.eup %1176 }
 0x22a   :  { %v1571_v29 = vadd.f32 %v568_v61, %v1430_v24  ;;  %v561_v45 = vsub.f32 %v1177_v21, %v1438_v26  ;;  %v1179_v3 = vpop.eup %1178 }
 0x22c   :  { %v1576_v46 = vpack.c.bf16 %v1571_v29, %v1568_v19  ;;  %v569_v51 = vmul.f32 %v1179_v3, %v561_v45 }
 0x22d   :  { %v1181_v48 = vpop.eup %1180 }
 0x22e   :  { %636 = vmatmul.mubr.bf16.gmra.mxu0 %v1576_v46  ;;  %v562_v49 = vsub.f32 %v1181_v48, %v1440_v27  ;;  %v1183_v52 = vpop.eup %1182  ;;  %v1582_v24 = vadd.f32 %v569_v51, %v1438_v26 }
 0x22f   :  { %645 = vmatprep.mubr.bf16.mxu0 %v1373_v0 }
 0x230   :  { %v570_v23 = vmul.f32 %v1183_v52, %v562_v49 }
 0x232   :  { %v1585_v54 = vadd.f32 %v570_v23, %v1440_v27 }
 0x234   :  { %v1589_v55 = vpack.c.bf16 %v1585_v54, %v1582_v24 }
 0x236   :  { %646 = vmatmul.mubr.bf16.gmra.mxu0 %v1589_v55 }
 0x2dd   :  { %v617_v9 = vpop.f32.mrf.mxu0 }
 0x2de   :  { %v943_v57 = vmul.f32 -1.442695, %v617_v9 }
 0x2df   :  { %v1592_v58 = vpop.f32.mrf.mxu0 }
 0x2e0   :  { %1184 = vpow2.f32 %v943_v57 }
 0x2e1   :  { %v621_v59 = vpop.f32.mrf.mxu0 }
 0x2e2   :  { %v945_v0 = vmul.f32 -1.442695, %v621_v59 }
 0x2e3   :  { %v1594_v60 = vpop.f32.mrf.mxu0 }
 0x2e4   :  { %1186 = vpow2.f32 %v945_v0 }
 0x2e5   :  { %v627_v26 = vpop.f32.mrf.mxu0 }
 0x2e6   :  { %v947_v22 = vmul.f32 -1.442695, %v627_v26 }
 0x2e7   :  { %v1596_v27 = vpop.f32.mrf.mxu0 }
 0x2e8   :  { %1188 = vpow2.f32 %v947_v22  ;;  %v946_v22 = vmul.f32 -1.442695, %v1594_v60 }
 0x2e9   :  { %v631_v30 = vpop.f32.mrf.mxu0 }
 0x2ea   :  { %v949_v31 = vmul.f32 -1.442695, %v631_v30 }
 0x2eb   :  { %v1598_v62 = vpop.f32.mrf.mxu0 }
 0x2ec   :  { %1190 = vpow2.f32 %v949_v31 }
 0x2ed   :  { %v1185_v32 = vpop.eup %1184 }
 0x2ee   :  { %v704_v33 = vadd.f32 1.0, %v1185_v32  ;;  %v637_v25 = vpop.f32.mrf.mxu0 }
 0x2ef   :  { %v951_v34 = vmul.f32 -1.442695, %v637_v25 }
 0x2f0   :  { %v1600_v35 = vpop.f32.mrf.mxu0 }
 0x2f1   :  { %v1187_v63 = vpop.eup %1186  ;;  %1192 = vpow2.f32 %v951_v34 }
 0x2f2   :  { %1194 = vrcp.f32 %v704_v33  ;;  %v706_v28 = vadd.f32 1.0, %v1187_v63  ;;  %v641_v36 = vpop.f32.mrf.mxu0  ;;  %v948_v33 = vmul.f32 -1.442695, %v1596_v27  ;;  %v950_v63 = vmul.f32 -1.442695, %v1598_v62 }
 0x2f3   :  { %v953_v37 = vmul.f32 -1.442695, %v641_v36 }
 0x2f4   :  { %1196 = vrcp.f32 %v706_v28  ;;  %v1602_v38 = vpop.f32.mrf.mxu0 }
 0x2f5   :  { %v1189_v39 = vpop.eup %1188  ;;  %1198 = vpow2.f32 %v953_v37 }
 0x2f6   :  { %v708_v40 = vadd.f32 1.0, %v1189_v39  ;;  %v647_v1 = vpop.f32.mrf.mxu0  ;;  %v952_v39 = vmul.f32 -1.442695, %v1600_v35 }
 0x2f7   :  { %v955_v42 = vmul.f32 -1.442695, %v647_v1 }
 0x2f8   :  { %v1604_v43 = vpop.f32.mrf.mxu0 }
 0x2f9   :  { %v1191_v44 = vpop.eup %1190  ;;  %1200 = vpow2.f32 %v955_v42 }
 0x2fa   :  { %1202 = vrcp.f32 %v708_v40  ;;  %v710_v47 = vadd.f32 1.0, %v1191_v44  ;;  %v651_v4 = vpop.f32.mrf.mxu0  ;;  %v954_v44 = vmul.f32 -1.442695, %v1602_v38 }
 0x2fb   :  { %v957_v50 = vmul.f32 -1.442695, %v651_v4 }
 0x2fc   :  { %1204 = vrcp.f32 %v710_v47 }
 0x2fd   :  { %1206 = vpow2.f32 %v957_v50 }
 0x2fe   :  { %v1193_v5 = vpop.eup %1192 }
 0x2ff   :  { %v1195_v8 = vpop.eup %1194  ;;  %v712_v6 = vadd.f32 1.0, %v1193_v5 }
 0x300   :  { %v752_v53 = vmul.f32 %v1195_v8, %v1543_v41 }
 0x301   :  { %v1197_v7 = vpop.eup %1196  ;;  %1208 = vrcp.f32 %v712_v6  ;;  %v956_v6 = vmul.f32 -1.442695, %v1604_v43 }
 0x302   :  { %v1199_v10 = vpop.eup %1198  ;;  %v753_v11 = vmul.f32 %v1197_v7, %v1546_v2 }
 0x303   :  { %v714_v14 = vadd.f32 1.0, %v1199_v10  ;;  %v653_v10 = vpop.f32.mrf.mxu0 }
 0x304   :  { %v760_v15 = vpack.c.bf16 %v753_v11, %v752_v53 }
 0x305   :  { %1210 = vrcp.f32 %v714_v14 }
 0x306   :  { %v1201_v16 = vpop.eup %1200  ;;  %797 = vmatmul.mubr.bf16.vlgmr.msra.gmra.mxu1 %v760_v15  ;;  %v958_v15 = vmul.f32 -1.442695, %v653_v10 }
 0x307   :  { %v1203_v17 = vpop.eup %1202  ;;  %v716_v20 = vadd.f32 1.0, %v1201_v16  ;;  %804 = vmatprep.mubr.bf16.mxu1 %v1562_v56 }
 0x308   :  { %v754_v21 = vmul.f32 %v1203_v17, %v1554_v12 }
 0x309   :  { %v1205_v18 = vpop.eup %1204  ;;  %1212 = vrcp.f32 %v716_v20 }
 0x30a   :  { %v1207_v61 = vpop.eup %1206  ;;  %v755_v45 = vmul.f32 %v1205_v18, %v1557_v13 }
 0x30b   :  { %v718_v3 = vadd.f32 1.0, %v1207_v61 }
 0x30c   :  { %v761_v48 = vpack.c.bf16 %v755_v45, %v754_v21 }
 0x30d   :  { %1214 = vrcp.f32 %v718_v3 }
 0x30e   :  { %805 = vmatmul.mubr.bf16.gmra.mxu1 %v761_v48  ;;  %v1209_v49 = vpop.eup %1208 }
 0x30f   :  { %812 = vmatprep.mubr.bf16.mxu1 %v1576_v46  ;;  %v756_v52 = vmul.f32 %v1209_v49, %v1568_v19  ;;  %v944_v46 = vmul.f32 -1.442695, %v1592_v58 }
 0x311   :  { %1216 = vpow2.f32 %v944_v46 }
 0x312   :  { %v1211_v51 = vpop.eup %1210  ;;  %1218 = vpow2.f32 %v946_v22 }
 0x313   :  { %v757_v23 = vmul.f32 %v1211_v51, %v1571_v29 }
 0x315   :  { %v762_v56 = vpack.c.bf16 %v757_v23, %v756_v52 }
 0x316   :  { %v1213_v9 = vpop.eup %1212 }
 0x317   :  { %813 = vmatmul.mubr.bf16.gmra.mxu1 %v762_v56  ;;  %v758_v59 = vmul.f32 %v1213_v9, %v1582_v24 }
 0x318   :  { %820 = vmatprep.mubr.bf16.mxu1 %v1589_v55 }
 0x31a   :  { %v1215_v57 = vpop.eup %1214 }
 0x31b   :  { %v759_v0 = vmul.f32 %v1215_v57, %v1585_v54 }
 0x31d   :  { %v763_v26 = vpack.c.bf16 %v759_v0, %v758_v59 }
 0x31e   :  { %v1217_v60 = vpop.eup %1216 }
 0x31f   :  { %821 = vmatmul.mubr.bf16.gmra.mxu1 %v763_v26  ;;  %v705_v27 = vadd.f32 1.0, %v1217_v60  ;;  %v1219_v42 = vpop.eup %1218 }
 0x320   :  { %v707_v50 = vadd.f32 1.0, %v1219_v42 }
 0x3c6   :  { %v1015_v30 = vpop.f32.mrf.mxu1 }
 0x3c8   :  { %v1016_v31 = vpop.f32.mrf.mxu1 }
 0x3c9   :  { %v1017_v32 = vadd.f32 %v1016_v31, %v1015_v30 }
 0x3ca   :  { %v1018_v25 = vpop.f32.mrf.mxu1 }
 0x3cb   :  { %1220 = vtanh.f32 %v1017_v32 }
 0x3cc   :  { %v1019_v55 = vpop.f32.mrf.mxu1  ;;  %1222 = vpow2.f32 %v948_v33 }
 0x3cd   :  { %v1020_v34 = vadd.f32 %v1019_v55, %v1018_v25 }
 0x3ce   :  { %v1021_v28 = vpop.f32.mrf.mxu1 }
 0x3cf   :  { %1224 = vtanh.f32 %v1020_v34 }
 0x3d0   :  { %v1022_v36 = vpop.f32.mrf.mxu1  ;;  %1226 = vpow2.f32 %v950_v63 }
 0x3d1   :  { %v1023_v58 = vadd.f32 %v1022_v36, %v1021_v28 }
 0x3d2   :  { %v1024_v37 = vpop.f32.mrf.mxu1 }
 0x3d3   :  { %1228 = vtanh.f32 %v1023_v58 }
 0x3d4   :  { %v1025_v40 = vpop.f32.mrf.mxu1 }
 0x3d5   :  { %v1026_v1 = vadd.f32 %v1025_v40, %v1024_v37 }
 0x3d7   :  { %1230 = vtanh.f32 %v1026_v1  ;;  %v1027_v47 = vpop.f32.mrf.mxu1 }
 0x3d8   :  { %v1221_v4 = vpop.eup %1220  ;;  %1232 = vpow2.f32 %v952_v39 }
 0x3d9   :  { %1234 = vtanh.f32 %v1221_v4  ;;  %v1028_v62 = vpop.f32.mrf.mxu1  ;;  %v1223_v8 = vpop.eup %1222 }
 0x3da   :  { %1236 = vrcp.f32 %v705_v27  ;;  %v1029_v5 = vadd.f32 %v1028_v62, %v1027_v47  ;;  %v709_v38 = vadd.f32 1.0, %v1223_v8 }
 0x3db   :  { %1238 = vpow2.f32 %v954_v44  ;;  %v1030_v35 = vpop.f32.mrf.mxu1 }
 0x3dc   :  { %v1225_v7 = vpop.eup %1224  ;;  %1240 = vtanh.f32 %v1029_v5 }
 0x3dd   :  { %1242 = vtanh.f32 %v1225_v7  ;;  %v1031_v53 = vpop.f32.mrf.mxu1  ;;  %v1227_v14 = vpop.eup %1226 }
 0x3de   :  { %1244 = vrcp.f32 %v707_v50  ;;  %v1032_v11 = vadd.f32 %v1031_v53, %v1030_v35  ;;  %v711_v43 = vadd.f32 1.0, %v1227_v14 }
 0x3df   :  { %1246 = vpow2.f32 %v956_v6  ;;  %v1033_v16 = vpop.f32.mrf.mxu1 }
 0x3e0   :  { %v1229_v17 = vpop.eup %1228  ;;  %1248 = vtanh.f32 %v1032_v11 }
 0x3e1   :  { %1250 = vtanh.f32 %v1229_v17  ;;  %v1034_v20 = vpop.f32.mrf.mxu1 }
 0x3e2   :  { %1252 = vrcp.f32 %v709_v38  ;;  %v1035_v18 = vadd.f32 %v1034_v20, %v1033_v16 }
 0x3e3   :  { %1254 = vpow2.f32 %v958_v15  ;;  %v1036_v61 = vpop.f32.mrf.mxu1 }
 0x3e4   :  { %v1231_v21 = vpop.eup %1230  ;;  %1256 = vtanh.f32 %v1035_v18 }
 0x3e5   :  { %v1233_v45 = vpop.eup %1232  ;;  %1258 = vtanh.f32 %v1231_v21  ;;  %v1037_v3 = vpop.f32.mrf.mxu1 }
 0x3e6   :  { %v1235_v48 = vpop.eup %1234  ;;  %v1038_v49 = vadd.f32 %v1037_v3, %v1036_v61  ;;  %1260 = vrcp.f32 %v711_v43  ;;  %v713_v56 = vadd.f32 1.0, %v1233_v45 }
 0x3e7   :  { %v1237_v51 = vpop.eup %1236  ;;  %v845_v52 = vsub.f32 %v1235_v48, %v1543_v41 }
 0x3e8   :  { %v1239_v23 = vpop.eup %1238  ;;  %1262 = vtanh.f32 %v1038_v49 }
 0x3e9   :  { %v1241_v9 = vpop.eup %1240  ;;  %v853_v57 = vmul.f32 %v1237_v51, %v845_v52  ;;  %v715_v30 = vadd.f32 1.0, %v1239_v23 }
 0x3ea   :  { %v1243_v59 = vpop.eup %1242  ;;  %1264 = vtanh.f32 %v1241_v9 }
 0x3eb   :  { %v1245_v0 = vpop.eup %1244  ;;  %v861_v26 = vadd.f32 %v853_v57, %v1543_v41  ;;  %v846_v46 = vsub.f32 %v1243_v59, %v1546_v2  ;;  %1266 = vrcp.f32 %v713_v56 }
 0x3ec   :  { %v1247_v22 = vpop.eup %1246 }
 0x3ed   :  { %v1249_v31 = vpop.eup %1248  ;;  %869 = vst [vmem:[#allocation8] sm:$0xff] %v861_v26  ;;  %v854_v32 = vmul.f32 %v1245_v0, %v846_v46  ;;  %v717_v28 = vadd.f32 1.0, %v1247_v22 }
 0x3ee   :  { %v1251_v33 = vpop.eup %1250  ;;  %1268 = vtanh.f32 %v1249_v31 }
 0x3ef   :  { %v1253_v25 = vpop.eup %1252  ;;  %v862_v55 = vadd.f32 %v854_v32, %v1546_v2  ;;  %v847_v34 = vsub.f32 %v1251_v33, %v1554_v12  ;;  %1270 = vrcp.f32 %v715_v30 }
 0x3f0   :  { %v1255_v63 = vpop.eup %1254 }
 0x3f1   :  { %v1257_v36 = vpop.eup %1256  ;;  %870 = vst [vmem:[#allocation8 + $0x8] sm:$0xff] %v862_v55  ;;  %v855_v41 = vmul.f32 %v1253_v25, %v847_v34  ;;  %v719_v40 = vadd.f32 1.0, %v1255_v63 }
 0x3f2   :  { %v1259_v58 = vpop.eup %1258  ;;  %1272 = vtanh.f32 %v1257_v36 }
 0x3f3   :  { %v863_v37 = vadd.f32 %v855_v41, %v1554_v12  ;;  %v848_v60 = vsub.f32 %v1259_v58, %v1557_v13  ;;  %v1261_v39 = vpop.eup %1260  ;;  %1274 = vrcp.f32 %v717_v28 }
 0x3f5   :  { %v1263_v1 = vpop.eup %1262  ;;  %871 = vst [vmem:[#allocation8 + $0x10] sm:$0xff] %v863_v37  ;;  %v856_v2 = vmul.f32 %v1261_v39, %v848_v60 }
 0x3f6   :  { %1276 = vtanh.f32 %v1263_v1 }
 0x3f7   :  { %v1265_v27 = vpop.eup %1264  ;;  %v864_v42 = vadd.f32 %v856_v2, %v1557_v13  ;;  %1278 = vrcp.f32 %v719_v40 }
 0x3f8   :  { %v849_v44 = vsub.f32 %v1265_v27, %v1568_v19  ;;  %v1267_v47 = vpop.eup %1266 }
 0x3f9   :  { %872 = vst [vmem:[#allocation8 + $0x18] sm:$0xff] %v864_v42 }
 0x3fa   :  { %v857_v4 = vmul.f32 %v1267_v47, %v849_v44 }
 0x3fb   :  { %v1269_v62 = vpop.eup %1268 }
 0x3fc   :  { %v865_v12 = vadd.f32 %v857_v4, %v1568_v19  ;;  %v850_v50 = vsub.f32 %v1269_v62, %v1571_v29  ;;  %v1271_v5 = vpop.eup %1270 }
 0x3fe   :  { %873 = vst [vmem:[#allocation8 + $0x20] sm:$0xff] %v865_v12  ;;  %v858_v8 = vmul.f32 %v1271_v5, %v850_v50 }
 0x3ff   :  { %v1273_v6 = vpop.eup %1272 }
 0x400   :  { %v866_v35 = vadd.f32 %v858_v8, %v1571_v29  ;;  %v851_v7 = vsub.f32 %v1273_v6, %v1582_v24  ;;  %v1275_v13 = vpop.eup %1274 }
 0x402   :  { %874 = vst [vmem:[#allocation8 + $0x28] sm:$0xff] %v866_v35  ;;  %v859_v10 = vmul.f32 %v1275_v13, %v851_v7 }
 0x403   :  { %v1277_v53 = vpop.eup %1276 }
 0x404   :  { %v867_v38 = vadd.f32 %v859_v10, %v1582_v24  ;;  %v852_v11 = vsub.f32 %v1277_v53, %v1585_v54  ;;  %v1279_v14 = vpop.eup %1278 }
 0x406   :  { %875 = vst [vmem:[#allocation8 + $0x30] sm:$0xff] %v867_v38  ;;  %v860_v19 = vmul.f32 %v1279_v14, %v852_v11 }
 0x408   :  { %v868_v15 = vadd.f32 %v860_v19, %v1585_v54 }
 0x40a   :  { %876 = vst [vmem:[#allocation8 + $0x38] sm:$0xff] %v868_v15 }
 0x40b   :  { %1351 = shalt.err (!%p1348_p5)
}
 0x40c   :  { %888 = dma.vmem_to_hbm [thread:$0]  %s883_s2, 1024, %s1649_s3, [#allocation4], %s1368_s17, %s1368_s17, %s1369_s18  }
 0x40d   :  { %1364 = dma.done.wait [#allocation4], 1024  }
 0x40e   :  { %1365 = vsyncadd [#allocation4], 4294966272 }
 0x40f   :  { %892 = vsyncpa [#allocation3], 1 }
 0x410   :  { %893 = vsyncpa [#allocation6], 1 }
 0x411   :  { %894 = vsyncpa [#allocation4], 1 }

</bundles_post_ra>
